<compile_context>
chip_gen: v7x
topology: tpu7x:2x2x1
jax: 0.10.0
libtpu: 0.0.40
codegen_flags: <defaults>
</compile_context>

<pallas_src>
import functools

import jax
import jax.numpy as jnp
from jax.experimental import pallas as pl
from jax.experimental.pallas import tpu as pltpu


# ----------------------------------------------------------------------------
# Kernel
# ----------------------------------------------------------------------------
def _bridging_kernel(x_ref, w_ref, b_ref, o_ref):
    # x_ref: (B, H_in)  bf16  -- resident across all column tiles (tiny)
    # w_ref: (H_in, TN) bf16  -- streamed column tile of the transposed weight
    # b_ref: (1, TN)    f32   -- bias column tile
    # o_ref: (B, TN)          -- output column tile (lane-dense writeback)
    acc = jnp.dot(x_ref[...], w_ref[...], preferred_element_type=jnp.float32)
    o_ref[...] = (acc + b_ref[...]).astype(o_ref.dtype)


# ----------------------------------------------------------------------------
# Hardware-aware sizing helpers (static / trace-time Python only)
# ----------------------------------------------------------------------------
_DEFAULT_VMEM_BYTES = 64 << 20  # conservative default: v7x physical VMEM per TC


def _vmem_capacity_bytes():
    try:
        info = pltpu.get_tpu_info()
    except Exception:
        return _DEFAULT_VMEM_BYTES
    for name in ("vmem_capacity_bytes", "vmem_bytes", "vmem_size_bytes"):
        v = getattr(info, name, None)
        if v is not None:
            try:
                v = int(v)
            except (TypeError, ValueError):
                continue
            if v > 0:
                return v
    return _DEFAULT_VMEM_BYTES


def _num_tensorcores():
    try:
        info = pltpu.get_tpu_info()
    except Exception:
        return 1
    for name in ("num_cores", "core_count", "num_tensorcores", "tensorcore_count"):
        v = getattr(info, name, None)
        if v is not None:
            try:
                v = int(v)
            except (TypeError, ValueError):
                continue
            if v > 0:
                return v
    return 1


def _dim_semantics(num_tiles):
    """Output-column tiles are fully independent.  On multi-TC chips (v7x) use
    CORE_PARALLEL so the grid is actually split across TensorCores (plain
    "parallel" is measured near-neutral); single-TC chips keep "parallel"."""
    n_cores = _num_tensorcores()
    if n_cores > 1 and num_tiles > 1 and num_tiles % n_cores == 0:
        return (pltpu.CORE_PARALLEL,)
    return ("parallel",)


def _pick_tile_n(h_in, h_out, w_itemsize, weight_slab_budget_bytes):
    """Column-tile width TN (output features per grid step).

    * Whole output in one block when the double-buffered weight fits the budget
      (or H_out is small).
    * Otherwise the largest 128-multiple that fits, never below 512 so each
      strided weight row DMA is >= 1 KiB (keeps the dominant stream at roofline).
    * Prefers an exact divisor of H_out; otherwise the last tile is ragged and
      the grid uses pl.cdiv (Pallas masks the partial block on writeback).
    """
    if h_out <= 512 or 2 * h_in * h_out * w_itemsize <= weight_slab_budget_bytes:
        return h_out
    max_tn = weight_slab_budget_bytes // (2 * h_in * w_itemsize)
    max_tn = max((max_tn // 128) * 128, 512)
    max_tn = min(max_tn, h_out)
    if h_out % 128 == 0:
        tn = max_tn
        while tn >= 512:
            if h_out % tn == 0:
                return tn
            tn -= 128
    return max_tn  # ragged last tile handled via pl.cdiv grid


# ----------------------------------------------------------------------------
# One-time parameter preparation (keep OUT of the per-call jitted path)
# ----------------------------------------------------------------------------
def prepare_bridging_params(weight, bias):
    """PyTorch nn.Linear stores weight as (out_features, in_features); forward is
    x @ W.T + b.  Transpose to (in, out) and cast to bf16 ONCE at init so the hot
    path streams bf16 straight from HBM with no per-call f32->bf16 materialization."""
    w_t_bf16 = jnp.asarray(weight).T.astype(jnp.bfloat16)   # (H_in, H_out)
    b_f32 = jnp.asarray(bias).reshape(1, -1).astype(jnp.float32)
    return w_t_bf16, b_f32


# ----------------------------------------------------------------------------
# Forward pass
# ----------------------------------------------------------------------------
@functools.partial(jax.jit, static_argnames=("num_virtual_tokens", "tile_n"))
def embedding_bridging(pooled_embeds, weight_t_bf16, bias_f32, num_virtual_tokens,
                       tile_n=None):
    """Equivalent to: x = pooled_embeds @ W.T + b; x.view(B, num_virtual_tokens, -1)."""
    bsz, h_in = pooled_embeds.shape
    h_in_w, h_out = weight_t_bf16.shape
    assert h_in_w == h_in
    assert h_out % num_virtual_tokens == 0
    llama_hidden = h_out // num_virtual_tokens

    # Tiny activation; in-jit cast is negligible bytes (fused by XLA).
    x_bf16 = pooled_embeds.astype(jnp.bfloat16)
    b_f32 = bias_f32.reshape(1, h_out).astype(jnp.float32)

    # Generation-aware tiling: ~40% of physical VMEM for the double-buffered bf16
    # weight slab (v5e/v6e 128 MiB -> ~25 MiB/buffer; v7x 64 MiB -> ~12 MiB/buffer).
    vmem_phys = _vmem_capacity_bytes()
    weight_slab_budget = int(vmem_phys * 0.40)
    tn = tile_n if tile_n is not None else _pick_tile_n(h_in, h_out, 2, weight_slab_budget)
    num_tiles = pl.cdiv(h_out, tn)

    out_dtype = pooled_embeds.dtype
    out_itemsize = jnp.dtype(out_dtype).itemsize
    bsz_pad = max(8, ((bsz + 7) // 8) * 8)

    # Explicit scoped-VMEM limit covering the double-buffered working set + headroom.
    vmem_need = (2 * h_in * tn * 2                      # weight (bf16, double-buffered)
                 + 2 * bsz_pad * h_in * 2               # x (bf16)
                 + 2 * 8 * tn * 4                       # bias (f32, padded to 8 sublanes)
                 + 2 * bsz_pad * tn * out_itemsize)     # output
    vmem_limit = min(int(vmem_phys * 0.90), vmem_need + (8 << 20), 100 << 20)
    vmem_limit = max(vmem_limit, 32 << 20)

    cost = pl.CostEstimate(
        flops=2 * bsz * h_in * h_out,
        transcendentals=0,
        bytes_accessed=(h_in * h_out * 2               # bf16 weight stream (dominant)
                        + bsz * h_in * 2               # bf16 activations
                        + h_out * 4                    # f32 bias
                        + bsz * h_out * out_itemsize), # output writeback
    )

    out = pl.pallas_call(
        _bridging_kernel,
        out_shape=jax.ShapeDtypeStruct((bsz, h_out), out_dtype),
        grid_spec=pltpu.PrefetchScalarGridSpec(
            num_scalar_prefetch=0,
            grid=(num_tiles,),
            in_specs=[
                pl.BlockSpec((bsz, h_in), lambda j: (0, 0)),  # x: same (resident) block
                pl.BlockSpec((h_in, tn), lambda j: (0, j)),   # weight: streamed column tiles
                pl.BlockSpec((1, tn), lambda j: (0, j)),      # bias: matching column tile
            ],
            out_specs=pl.BlockSpec((bsz, tn), lambda j: (0, j)),
        ),
        compiler_params=pltpu.CompilerParams(
            dimension_semantics=_dim_semantics(num_tiles),
            vmem_limit_bytes=vmem_limit,
        ),
        cost_estimate=cost,
    )(x_bf16, weight_t_bf16, b_f32)

    # Contiguous split of the last dim: pure metadata reshape, no copy.
    return out.reshape(bsz, num_virtual_tokens, llama_hidden)


# ----------------------------------------------------------------------------
# Reference + tests
# ----------------------------------------------------------------------------
def _reference(pooled_embeds, weight, bias, num_virtual_tokens):
    # PyTorch semantics: nn.Linear -> x @ W.T + b, then view(B, V, -1).
    bsz = pooled_embeds.shape[0]
    h_out = weight.shape[0]
    x = pooled_embeds @ weight.T + bias.reshape(1, h_out)
    return x.reshape(bsz, num_virtual_tokens, h_out // num_virtual_tokens)


if __name__ == "__main__":
    key = jax.random.PRNGKey(0)

    # --- Test 1: small shapes implied by the module (single column tile). ---
    batch = 2
    byt5_hidden_size = 32
    llama_hidden_size = 64
    num_virtual_tokens = 4
    out_features = num_virtual_tokens * llama_hidden_size  # 256

    k_x, k_w, k_b, k2_x, k2_w, k2_b = jax.random.split(key, 6)

    weight = jax.random.normal(k_w, (out_features, byt5_hidden_size), jnp.float32) * 0.02
    bias = jax.random.normal(k_b, (out_features,), jnp.float32) * 0.02
    pooled = jax.random.normal(k_x, (batch, byt5_hidden_size), jnp.float32)

    # One-time, out-of-hot-path weight conversion (transpose + bf16 cast).
    w_t_bf16, b_f32 = prepare_bridging_params(weight, bias)
    w_t_bf16, b_f32 = jax.block_until_ready((w_t_bf16, b_f32))

    result = embedding_bridging(pooled, w_t_bf16, b_f32, num_virtual_tokens)
    result = jax.block_until_ready(result)
    ref = _reference(pooled, weight, bias, num_virtual_tokens)
    assert result.shape == (batch, num_virtual_tokens, llama_hidden_size)
    # bf16 weight/activation stream -> loosened tolerance vs f32 reference.
    assert jnp.allclose(result, ref, atol=2e-2, rtol=2e-2), "small-shape mismatch"

    # --- Test 2: larger shapes with a forced multi-tile grid (exercises the
    #     H_out streaming / double-buffering path). ---
    byt5_hidden2 = 256
    llama_hidden2 = 512
    vtok2 = 4
    out2 = vtok2 * llama_hidden2  # 2048

    weight2 = jax.random.normal(k2_w, (out2, byt5_hidden2), jnp.float32) * 0.02
    bias2 = jax.random.normal(k2_b, (out2,), jnp.float32) * 0.02
    pooled2 = jax.random.normal(k2_x, (batch, byt5_hidden2), jnp.float32)

    w2_t_bf16, b2_f32 = prepare_bridging_params(weight2, bias2)
    w2_t_bf16, b2_f32 = jax.block_until_ready((w2_t_bf16, b2_f32))

    result2 = embedding_bridging(pooled2, w2_t_bf16, b2_f32, vtok2, tile_n=512)  # grid=(4,)
    result2 = jax.block_until_ready(result2)
    ref2 = _reference(pooled2, weight2, bias2, vtok2)
    assert result2.shape == (batch, vtok2, llama_hidden2)
    assert jnp.allclose(result2, ref2, atol=2e-2, rtol=2e-2), "tiled-shape mismatch"

    print("KERNEL_OK")
</pallas_src>

<mosaic_0001>
module attributes {stable_mosaic.version = 11 : i64} {
  func.func @_bridging_kernel(%arg0: i32, %arg1: memref<2x32xbf16, #tpu.memory_space<vmem>>, %arg2: memref<32x256xbf16, #tpu.memory_space<vmem>>, %arg3: memref<1x256xf32, #tpu.memory_space<vmem>>, %arg4: memref<2x256xf32, #tpu.memory_space<vmem>>) attributes {dimension_semantics = [#tpu.dimension_semantics<parallel>], iteration_bounds = array<i64: 1>, scalar_prefetch = 0 : i64, scratch_operands = 0 : i64, tpu.core_type = #tpu.core_type<tc>, window_params = [{pipeline_mode = #tpu.pipeline_mode<synchronous>, transform_indices = @transform_0, window_bounds = array<i64: 2, 32>}, {transform_indices = @transform_1, window_bounds = array<i64: 32, 256>}, {transform_indices = @transform_2, window_bounds = array<i64: 1, 256>}, {transform_indices = @transform_3, window_bounds = array<i64: 2, 256>}]} {
    %c0 = arith.constant 0 : index
    %c0_0 = arith.constant 0 : index
    %0 = vector.load %arg1[%c0, %c0_0] : memref<2x32xbf16, #tpu.memory_space<vmem>>, vector<2x32xbf16>
    %c0_1 = arith.constant 0 : index
    %c0_2 = arith.constant 0 : index
    %1 = vector.load %arg2[%c0_1, %c0_2] : memref<32x256xbf16, #tpu.memory_space<vmem>>, vector<32x256xbf16>
    %cst = arith.constant dense<0.000000e+00> : vector<2x256xf32>
    %2 = tpu.matmul %0, %1, %cst {dimension_numbers = #tpu.dot_dimension_numbers<[1], [0], [0], [1], [0, 0, 1, 1], [], []>} : vector<2x32xbf16>, vector<32x256xbf16>, vector<2x256xf32> -> vector<2x256xf32>
    %c0_3 = arith.constant 0 : index
    %c0_4 = arith.constant 0 : index
    %3 = vector.load %arg3[%c0_3, %c0_4] : memref<1x256xf32, #tpu.memory_space<vmem>>, vector<1x256xf32>
    %4 = vector.broadcast %3 : vector<1x256xf32> to vector<2x256xf32>
    %5 = arith.addf %2, %4 : vector<2x256xf32>
    %c0_5 = arith.constant 0 : index
    %c0_6 = arith.constant 0 : index
    %6 = vector.load %arg4[%c0_5, %c0_6] : memref<2x256xf32, #tpu.memory_space<vmem>>, vector<2x256xf32>
    tpu.vector_store %arg4[%c0_5, %c0_6], %5 {strides = array<i32>} : memref<2x256xf32, #tpu.memory_space<vmem>>, vector<2x256xf32>,
    return
  }
  func.func @transform_0(%arg0: i32) -> (i32, i32) {
    %c0_i32 = arith.constant 0 : i32
    %c0_i32_0 = arith.constant 0 : i32
    %c0_i32_1 = arith.constant 0 : i32
    return %c0_i32, %c0_i32_0 : i32, i32
  }
  func.func @transform_1(%arg0: i32) -> (i32, i32) {
    %c0_i32 = arith.constant 0 : i32
    %c0_i32_0 = arith.constant 0 : i32
    return %c0_i32, %arg0 : i32, i32
  }
  func.func @transform_2(%arg0: i32) -> (i32, i32) {
    %c0_i32 = arith.constant 0 : i32
    %c0_i32_0 = arith.constant 0 : i32
    return %c0_i32, %arg0 : i32, i32
  }
  func.func @transform_3(%arg0: i32) -> (i32, i32) {
    %c0_i32 = arith.constant 0 : i32
    %c0_i32_0 = arith.constant 0 : i32
    return %c0_i32, %arg0 : i32, i32
  }
}

</mosaic_0001>

<bundles_post_ra>
// kernel: embedding_bridging.1
= control target key start
LH: loop header
LB: loop body
LE: loop exit
PB: predicated region body
PF: predicated region fallthrough
CT: control target
= control target key end

     0   :  { %8 = vsyncpa [#allocation3], 0  ;;  %s168_s12 = smov [#allocation2]   ;;  %s213_s0 = inlined_call_operand.vmem [shape: bf16[2,32], index: 0, kind: input, shape index: {}]   ;;  %s214_s1 = inlined_call_operand.hbm [shape: bf16[32,256], index: 1, kind: input, shape index: {}]   ;;  %s215_s2 = inlined_call_operand.vmem [shape: f32[1,256], index: 2, kind: input, shape index: {}]   ;;  %s216_s3 = inlined_call_operand.vmem [shape: f32[2,256], index: 3, kind: output, shape index: {}]  }
   0x1   :  { %s16_s13 = sshll.u32 %s168_s12, 4  ;;  %s144_s16 = scalar_lea.hbm %s214_s1, 512  ;;  %s17_s13 = int_to_ptr.vmem [resolvable:$true] %s16_s13 }
   0x2   :  { %p145_p0 = scmp.ne.s32.totalorder %s214_s1, %s144_s16  ;;  %p148_p1 = scmp.lt.u32.totalorder %s144_s16, %s214_s1 }
   0x4   :  { %p150_p2 = pnand %p148_p1, %p145_p0 }
   0x6   :  { %153 = shalt.err (!%p150_p2)
}
   0x7   :  { %s154_s21 = scalar_lea.vmem %s17_s13, 512  ;;  %p159_p4 = scmp.lt.s32.totalorder %s17_s13, %s17_s13 }
   0x8   :  { %p155_p3 = scmp.ne.s32.totalorder %s17_s13, %s154_s21  ;;  %p160_p5 = scmp.lt.s32.totalorder %s154_s21, %s154_s21 }
   0xa   :  { %p161_p6 = por %p160_p5, %p159_p4 }
   0xc   :  { %p162_p7 = pnand %p161_p6, %p155_p3 }
   0xe   :  { %165 = shalt.err (!%p162_p7)
}
   0xf   :  { %s169_s22 = smov 128   ;;  %s170_s23 = smov 8  }
  0x10   :  { %22 = dma.hbm_to_vmem [thread:$0]  %s214_s1, 512, %s17_s13, [#allocation3], %s169_s22, %s169_s22, %s170_s23  }
  0x11   :  { %166 = dma.done.wait [#allocation3], 512  }
  0x12   :  { %167 = vsyncadd [#allocation3], 4294966784  ;;  %v171_v0 = vmov 0   ;;  %v138_v1 = vld [vmem:[#allocation2 + $0x4] ss:$8 sps:$4 sm:$0xff]   ;;  %vm66_vm0 = vcmask 261120   ;;  %v36_v6 = vlaneseq }
  0x13   :  { %102 = vmatprep.mubr.bf16.mxu0 %v171_v0  ;;  %v140_v2 = vld [vmem:[#allocation2] ss:$8 sps:$4 sm:$0xff]   ;;  %70 = vmatprep.subr.bf16.mxu0 %v138_v1  ;;  %v141_v3 = vld [vmem:[#allocation2 + $0x14] ss:$8 sps:$4 sm:$0xff]   ;;  %v143_v4 = vld [vmem:[#allocation2 + $0x10] ss:$8 sps:$4 sm:$0xff]  }
  0x14   :  { %71 = vmatpush1.bf16.msra.mxu0 %v140_v2  ;;  %v29_v5 = vld [vmem:[%s213_s0] sm:$0x1]  ;;  %v37_v7 = vshrl.u32 %v36_v6, 7 }
  0x15   :  { %72 = vmatprep.subr.bf16.mxu0 %v141_v3  ;;  %v34_v9 = vld [vmem:[%s215_s2] sm:$0x3] }
  0x16   :  { %v38_v8 = vsub.s32 0, %v37_v7  ;;  %v42_v10 = vsub.s32 1, %v37_v7 }
  0x18   :  { %73 = vmatpush1.bf16.msra.mxu0 %v143_v4  ;;  %v39_v11 = vrot.slane %v34_v9, %v38_v8  ;;  %v43_v12 = vrot.slane %v34_v9, %v42_v10 }
  0x1b   :  { %132 = vmatmul.mubr.msk.bf16.vlgmr.msra.gmra.mrb[0].mxu0 %vm66_vm0, %v29_v5 }
  0xee   :  { %v104_v13 = vpop.f32.mrb[0].mxu0 }
  0xef   :  { %v105_v14 = vadd.f32 %v104_v13, %v39_v11  ;;  %v106_v15 = vpop.f32.mrb[1].mxu0 }
  0xf0   :  { %v107_v16 = vadd.f32 %v106_v15, %v43_v12  ;;  %v108_v17 = vpop.f32.mrb[2].mxu0 }
  0xf1   :  { %v109_v18 = vpop.f32.mrb[3].mxu0 }
  0xf2   :  { %v113_v19 = vcombine.low %v105_v14, %v107_v16 }
  0xf4   :  { %133 = vst.sshfl [vmem:[%s216_s3] sm:$0x33 pattern:$0x76325410] %v113_v19 }
  0xf5   :  { %127 = vsyncpa [#allocation3], 1 }

</bundles_post_ra>
